<compile_context>
chip_gen: v7x
topology: tpu7x:2x2x1
jax: 0.10.0
libtpu: 0.0.40
codegen_flags: <defaults>
</compile_context>

<pallas_src>
import jax
import jax.numpy as jnp
from jax.experimental import pallas as pl
from jax.experimental.pallas import tpu as pltpu

ALPHA = 0.25
GAMMA = 2.0            # implemented as an explicit square (gamma == 2) below
LANES = 128
SUBLANES = 8
MAX_TILE_ROWS = 2048   # (2048,128) f32 = 1 MiB/input block; 2 in x 2 buf = 4 MiB VMEM


def _make_kernel(n_valid, tile_rows, n_blocks):
    """Build the per-block focal-loss partial-sum kernel with static sizes."""
    groups = tile_rows // SUBLANES
    total_slots = n_blocks * tile_rows * LANES
    needs_mask = n_valid < total_slots

    def _partial(focal):
        # (tile_rows, 128) -> (groups, 8, 128): pure sublane grouping of the
        # leading dim (layout-preserving), then an axis-0 vreg-wise add chain
        # on the VPU -> a single (8, 128) vreg partial sum.
        return focal.reshape(groups, SUBLANES, LANES).sum(axis=0)

    def kernel(x_ref, t_ref, out_ref):
        i = pl.program_id(0)

        # Cast to f32 in-kernel; HBM traffic stays in the caller's dtype.
        x = x_ref[...].astype(jnp.float32)
        t = t_ref[...].astype(jnp.float32)

        # d = 1 - pt, computed directly (pt = where(t==1, x, 1-x)).
        d = jnp.where(t == 1.0, 1.0 - x, x)

        # Numerically-stable BCE with logits, reduction='none'.
        bce = jnp.maximum(x, 0.0) - x * t + jnp.log1p(jnp.exp(-jnp.abs(x)))

        # ALPHA is applied once to the final scalar in the wrapper.
        focal = bce * (d * d)

        if needs_mask:
            is_last = i == pl.num_programs(0) - 1

            @pl.when(jnp.logical_not(is_last))
            def _():
                out_ref[0] = _partial(focal)

            @pl.when(is_last)
            def _():
                # Mask lane-pad / Pallas out-of-bounds tail elements of the
                # final tile, BEFORE the axis-0 partial sum.
                row = (jax.lax.broadcasted_iota(jnp.int32, focal.shape, 0)
                       + i * tile_rows)
                col = jax.lax.broadcasted_iota(jnp.int32, focal.shape, 1)
                idx = row * LANES + col
                out_ref[0] = _partial(jnp.where(idx < n_valid, focal, 0.0))
        else:
            out_ref[0] = _partial(focal)

    return kernel


def focal_loss(inputs, targets):
    """Mean focal loss over all elements. inputs/targets: same shape (e.g. NCHW)."""
    n_elems = inputs.size
    x = inputs.reshape(-1)
    t = targets.reshape(-1)

    # Pad only up to the next multiple of 8*128 = 1024 elements so the row
    # count is a multiple of 8 (needed for the single-vreg partial sum).
    # Padded slots are masked out in-kernel, so pad values are irrelevant.
    chunk = SUBLANES * LANES
    rem = n_elems % chunk
    if rem:
        pad = chunk - rem
        x = jnp.pad(x, (0, pad))
        t = jnp.pad(t, (0, pad))

    rows = x.size // LANES
    x2 = x.reshape(rows, LANES)
    t2 = t.reshape(rows, LANES)

    if rows <= MAX_TILE_ROWS:
        # Whole slab in VMEM, single grid step -> no pipelining overhead.
        tile_rows = rows
        n_blocks = 1
    else:
        tile_rows = MAX_TILE_ROWS
        n_blocks = pl.cdiv(rows, tile_rows)

    kernel = _make_kernel(n_elems, tile_rows, n_blocks)

    # Per-block (8,128) partial sums; the grid axis is "parallel" so v7x can
    # split blocks across both TensorCores. Tiny final reduce in the wrapper.
    partials = pl.pallas_call(
        kernel,
        out_shape=jax.ShapeDtypeStruct((n_blocks, SUBLANES, LANES), jnp.float32),
        grid_spec=pltpu.PrefetchScalarGridSpec(
            num_scalar_prefetch=0,
            grid=(n_blocks,),
            in_specs=[
                pl.BlockSpec((tile_rows, LANES), lambda i: (i, 0)),
                pl.BlockSpec((tile_rows, LANES), lambda i: (i, 0)),
            ],
            out_specs=pl.BlockSpec((1, SUBLANES, LANES), lambda i: (i, 0, 0)),
        ),
        compiler_params=pltpu.CompilerParams(
            dimension_semantics=("parallel",)),
    )(x2, t2)

    # alpha and the mean's 1/N applied once, to the final scalar.
    return jnp.sum(partials) * jnp.float32(ALPHA / n_elems)


def _reference(inputs, targets):
    x = inputs.astype(jnp.float32)
    t = targets.astype(jnp.float32)
    pt = jnp.where(t == 1.0, x, 1.0 - x)
    bce = jnp.maximum(x, 0.0) - x * t + jnp.log1p(jnp.exp(-jnp.abs(x)))
    return jnp.mean(ALPHA * (1.0 - pt) ** 2 * bce)


if __name__ == "__main__":
    key = jax.random.PRNGKey(0)
    k1, k2 = jax.random.split(key)
    # NCHW logits and binary targets, small shapes matching the module's use.
    x = jax.random.normal(k1, (2, 4, 16, 16), dtype=jnp.float32)
    t = (jax.random.uniform(k2, (2, 4, 16, 16)) > 0.5).astype(jnp.float32)

    out = focal_loss(x, t)
    jax.block_until_ready(out)

    ref = _reference(x, t)
    assert jnp.allclose(out, ref, atol=1e-5, rtol=1e-5), (out, ref)
    print("KERNEL_OK")
</pallas_src>

<mosaic_0001>
module attributes {stable_mosaic.version = 11 : i64} {
  func.func @kernel(%arg0: i32, %arg1: memref<16x128xf32, #tpu.memory_space<vmem>>, %arg2: memref<16x128xf32, #tpu.memory_space<vmem>>, %arg3: memref<1x8x128xf32, #tpu.memory_space<vmem>>) attributes {dimension_semantics = [#tpu.dimension_semantics<parallel>], iteration_bounds = array<i64: 1>, scalar_prefetch = 0 : i64, scratch_operands = 0 : i64, tpu.core_type = #tpu.core_type<tc>, window_params = [{transform_indices = @transform_0, window_bounds = array<i64: 16, 128>}, {transform_indices = @transform_1, window_bounds = array<i64: 16, 128>}, {transform_indices = @transform_2, window_bounds = array<i64: 1, 8, 128>}]} {
    %c0 = arith.constant 0 : index
    %c0_0 = arith.constant 0 : index
    %0 = vector.load %arg1[%c0, %c0_0] : memref<16x128xf32, #tpu.memory_space<vmem>>, vector<16x128xf32>
    %c0_1 = arith.constant 0 : index
    %c0_2 = arith.constant 0 : index
    %1 = vector.load %arg2[%c0_1, %c0_2] : memref<16x128xf32, #tpu.memory_space<vmem>>, vector<16x128xf32>
    %cst = arith.constant 1.000000e+00 : f32
    %2 = vector.broadcast %cst : f32 to vector<16x128xf32>
    %3 = arith.cmpf oeq, %1, %2 : vector<16x128xf32>
    %cst_3 = arith.constant 1.000000e+00 : f32
    %4 = vector.broadcast %cst_3 : f32 to vector<16x128xf32>
    %5 = arith.subf %4, %0 : vector<16x128xf32>
    %6 = arith.select %3, %5, %0 : vector<16x128xi1>, vector<16x128xf32>
    %cst_4 = arith.constant 0.000000e+00 : f32
    %7 = vector.broadcast %cst_4 : f32 to vector<16x128xf32>
    %8 = arith.maximumf %0, %7 : vector<16x128xf32>
    %9 = arith.mulf %0, %1 : vector<16x128xf32>
    %10 = arith.subf %8, %9 : vector<16x128xf32>
    %11 = math.absf %0 : vector<16x128xf32>
    %cst_5 = arith.constant 0.000000e+00 : f32
    %12 = vector.broadcast %cst_5 : f32 to vector<16x128xf32>
    %13 = arith.subf %12, %11 : vector<16x128xf32>
    %14 = math.exp %13 : vector<16x128xf32>
    %15 = math.log1p %14 : vector<16x128xf32>
    %16 = arith.addf %10, %15 : vector<16x128xf32>
    %17 = arith.mulf %6, %6 : vector<16x128xf32>
    %18 = arith.mulf %16, %17 : vector<16x128xf32>
    %19 = vector.shape_cast %18 : vector<16x128xf32> to vector<2x8x128xf32>
    %cst_6 = arith.constant dense<0.000000e+00> : vector<8x128xf32>
    %20 = vector.multi_reduction <add>, %19, %cst_6 [0] : vector<2x8x128xf32> to vector<8x128xf32>
    %c0_7 = arith.constant 0 : index
    %c0_8 = arith.constant 0 : index
    %c0_9 = arith.constant 0 : index
    %21 = vector.load %arg3[%c0_7, %c0_8, %c0_9] : memref<1x8x128xf32, #tpu.memory_space<vmem>>, vector<1x8x128xf32>
    %22 = vector.shape_cast %21 : vector<1x8x128xf32> to vector<8x128xf32>
    %23 = vector.shape_cast %20 : vector<8x128xf32> to vector<1x8x128xf32>
    tpu.vector_store %arg3[%c0_7, %c0_8, %c0_9], %23 {strides = array<i32>} : memref<1x8x128xf32, #tpu.memory_space<vmem>>, vector<1x8x128xf32>,
    return
  }
  func.func @transform_0(%arg0: i32) -> (i32, i32) {
    %c0_i32 = arith.constant 0 : i32
    %c0_i32_0 = arith.constant 0 : i32
    return %arg0, %c0_i32 : i32, i32
  }
  func.func @transform_1(%arg0: i32) -> (i32, i32) {
    %c0_i32 = arith.constant 0 : i32
    %c0_i32_0 = arith.constant 0 : i32
    return %arg0, %c0_i32 : i32, i32
  }
  func.func @transform_2(%arg0: i32) -> (i32, i32, i32) {
    %c0_i32 = arith.constant 0 : i32
    %c0_i32_0 = arith.constant 0 : i32
    %c0_i32_1 = arith.constant 0 : i32
    return %arg0, %c0_i32, %c0_i32_0 : i32, i32, i32
  }
}

</mosaic_0001>

<bundles_post_ra>
// kernel: tpu_custom_call.1
= control target key start
LH: loop header
LB: loop body
LE: loop exit
PB: predicated region body
PF: predicated region fallthrough
CT: control target
= control target key end

     0   :  { %7 = vsyncpa [#allocation3], 0  ;;  %s247_s0 = inlined_call_operand.hbm [shape: f32[16,128], index: 0, kind: input, shape index: {}]   ;;  %s248_s1 = inlined_call_operand.hbm [shape: f32[16,128], index: 1, kind: input, shape index: {}]   ;;  %s249_s2 = inlined_call_operand.hbm [shape: f32[1,8,128], index: 2, kind: output, shape index: {}]  }
   0x1   :  { %8 = vsyncpa [#allocation6], 0 }
   0x2   :  { %9 = vsyncpa [#allocation4], 0  ;;  %s191_s9 = smov [#allocation2]   ;;  %s119_s13 = scalar_lea.hbm %s247_s0, 256 }
   0x3   :  { %s15_s10 = sshll.u32 %s191_s9, 4  ;;  %p120_p0 = scmp.ne.s32.totalorder %s247_s0, %s119_s13  ;;  %s16_s10 = int_to_ptr.vmem [resolvable:$true] %s15_s10 }
   0x4   :  { %p123_p1 = scmp.lt.u32.totalorder %s119_s13, %s247_s0 }
   0x6   :  { %p125_p2 = pnand %p123_p1, %p120_p0 }
   0x8   :  { %128 = shalt.err (!%p125_p2)
}
   0x9   :  { %s129_s18 = scalar_lea.vmem %s16_s10, 256  ;;  %p134_p4 = scmp.lt.s32.totalorder %s16_s10, %s16_s10 }
   0xa   :  { %p130_p3 = scmp.ne.s32.totalorder %s16_s10, %s129_s18  ;;  %p135_p5 = scmp.lt.s32.totalorder %s129_s18, %s129_s18 }
   0xc   :  { %p136_p6 = por %p135_p5, %p134_p4 }
   0xe   :  { %p137_p7 = pnand %p136_p6, %p130_p3 }
  0x10   :  { %140 = shalt.err (!%p137_p7)
}
  0x11   :  { %s192_s19 = smov 128   ;;  %s193_s20 = smov 8  }
  0x12   :  { %21 = dma.hbm_to_vmem [thread:$0]  %s247_s0, 256, %s16_s10, [#allocation3], %s192_s19, %s192_s19, %s193_s20  }
  0x13   :  { %s194_s23 = smov [#allocation5]   ;;  %s141_s27 = scalar_lea.hbm %s248_s1, 256 }
  0x14   :  { %s27_s24 = sshll.u32 %s194_s23, 4  ;;  %p142_p8 = scmp.ne.s32.totalorder %s248_s1, %s141_s27  ;;  %s28_s24 = int_to_ptr.vmem [resolvable:$true] %s27_s24 }
  0x15   :  { %p145_p9 = scmp.lt.u32.totalorder %s141_s27, %s248_s1 }
  0x17   :  { %p147_p10 = pnand %p145_p9, %p142_p8 }
  0x19   :  { %150 = shalt.err (!%p147_p10)
}
  0x1a   :  { %s151_s4 = scalar_lea.vmem %s28_s24, 256  ;;  %p156_p12 = scmp.lt.s32.totalorder %s28_s24, %s28_s24 }
  0x1b   :  { %p152_p11 = scmp.ne.s32.totalorder %s28_s24, %s151_s4  ;;  %p157_p13 = scmp.lt.s32.totalorder %s151_s4, %s151_s4 }
  0x1d   :  { %p158_p0 = por %p157_p13, %p156_p12 }
  0x1f   :  { %p159_p1 = pnand %p158_p0, %p152_p11 }
  0x21   :  { %162 = shalt.err (!%p159_p1)
}
  0x22   :  { %33 = dma.hbm_to_vmem [thread:$0]  %s248_s1, 256, %s28_s24, [#allocation6], %s192_s19, %s192_s19, %s193_s20  }
  0x23   :  { %185 = dma.done.wait [#allocation3], 256  }
  0x24   :  { %186 = vsyncadd [#allocation3], 4294967040 }
  0x25   :  { %187 = dma.done.wait [#allocation6], 256  }
  0x26   :  { %188 = vsyncadd [#allocation6], 4294967040  ;;  %v40_v0 = vld [vmem:[#allocation2] sm:$0xff]  ;;  %v41_v1 = vld [vmem:[#allocation2 + $0x8] sm:$0xff]  ;;  %s195_s1 = smov [#allocation7]  }
  0x27   :  { %v56_v2 = vand.u32 2147483647, %v40_v0  ;;  %v57_v3 = vand.u32 2147483647, %v41_v1  ;;  %v42_v14 = vld [vmem:[#allocation5] sm:$0xff]  ;;  %v43_v15 = vld [vmem:[#allocation5 + $0x8] sm:$0xff] }
  0x28   :  { %vm44_vm0 = vcmp.eq.f32.partialorder %v42_v14, 1.0  ;;  %v46_v16 = vsub.f32 1.0, %v40_v0  ;;  %v47_v17 = vsub.f32 1.0, %v41_v1  ;;  %v50_v19 = vmax.f32 %v40_v0, 0.0  ;;  %s96_s6 = sshll.u32 %s195_s1, 4  ;;  %s97_s6 = int_to_ptr.vmem [resolvable:$true] %s96_s6 }
  0x29   :  { %v58_v4 = vsub.f32 0.0, %v56_v2  ;;  %v59_v5 = vsub.f32 0.0, %v57_v3  ;;  %v52_v20 = vmul.f32 %v42_v14, %v40_v0  ;;  %vm45_vm1 = vcmp.eq.f32.partialorder %v43_v15, 1.0  ;;  %s163_s7 = scalar_lea.vmem %s97_s6, 128  ;;  %p168_p3 = scmp.lt.s32.totalorder %s97_s6, %s97_s6 }
  0x2a   :  { %v51_v23 = vmax.f32 %v41_v1, 0.0  ;;  %v53_v24 = vmul.f32 %v43_v15, %v41_v1  ;;  %v48_v26 = vsel %vm44_vm0, %v46_v16, %v40_v0  ;;  %v49_v29 = vsel %vm45_vm1, %v47_v17, %v41_v1  ;;  %p164_p2 = scmp.ne.s32.totalorder %s97_s6, %s163_s7  ;;  %p169_p4 = scmp.lt.s32.totalorder %s163_s7, %s163_s7 }
  0x2b   :  { %v60_v6 = vmul.f32 1.442695, %v58_v4  ;;  %v62_v7 = vmul.f32 1.442695, %v59_v5  ;;  %v54_v30 = vsub.f32 %v50_v19, %v52_v20  ;;  %v84_v36 = vmul.f32 %v48_v26, %v48_v26 }
  0x2c   :  { %v55_v33 = vsub.f32 %v51_v23, %v53_v24  ;;  %v85_v38 = vmul.f32 %v49_v29, %v49_v29  ;;  %p170_p5 = por %p169_p4, %p168_p3 }
  0x2d   :  { %111 = vpow2.f32 %v60_v6 }
  0x2e   :  { %113 = vpow2.f32 %v62_v7  ;;  %p171_p6 = pnand %p170_p5, %p164_p2 }
  0x37   :  { %v112_v8 = vpop.eup %111 }
  0x38   :  { %v114_v9 = vpop.eup %113  ;;  %v64_v10 = vadd.f32 1.0, %v112_v8  ;;  %v67_v12 = vmul.f32 -0.5, %v112_v8  ;;  %v70_v21 = vand.u32 2147483647, %v112_v8 }
  0x39   :  { %v73_v11 = vadd.f32 1.0, %v114_v9  ;;  %v76_v13 = vmul.f32 -0.5, %v114_v9  ;;  %v79_v25 = vand.u32 2147483647, %v114_v9 }
  0x3a   :  { %115 = vlog2.f32 %v64_v10  ;;  %v68_v18 = vadd.f32 1.0, %v67_v12  ;;  %vm71_vm2 = vcmp.lt.f32.partialorder %v70_v21, 0.0004427343 }
  0x3b   :  { %117 = vlog2.f32 %v73_v11  ;;  %v77_v22 = vadd.f32 1.0, %v76_v13  ;;  %vm80_vm3 = vcmp.lt.f32.partialorder %v79_v25, 0.0004427343 }
  0x3c   :  { %v69_v27 = vmul.f32 %v112_v8, %v68_v18 }
  0x3d   :  { %v78_v31 = vmul.f32 %v114_v9, %v77_v22 }
  0x44   :  { %v116_v28 = vpop.eup %115 }
  0x45   :  { %v118_v32 = vpop.eup %117  ;;  %v66_v34 = vmul.f32 0.6931472, %v116_v28 }
  0x46   :  { %v75_v35 = vmul.f32 0.6931472, %v118_v32 }
  0x47   :  { %v72_v37 = vsel %vm71_vm2, %v69_v27, %v66_v34 }
  0x48   :  { %v81_v39 = vsel %vm80_vm3, %v78_v31, %v75_v35  ;;  %v82_v40 = vadd.f32 %v72_v37, %v54_v30 }
  0x49   :  { %v83_v41 = vadd.f32 %v81_v39, %v55_v33 }
  0x4a   :  { %v86_v42 = vmul.f32 %v84_v36, %v82_v40 }
  0x4b   :  { %v87_v43 = vmul.f32 %v85_v38, %v83_v41 }
  0x4d   :  { %v88_v44 = vadd.f32 %v87_v43, %v86_v42 }
  0x4f   :  { %89 = vst [vmem:[#allocation7] sm:$0xff] %v88_v44 }
  0x50   :  { %174 = shalt.err (!%p171_p6)
}
  0x51   :  { %s175_s10 = scalar_lea.hbm %s249_s2, 128 }
  0x52   :  { %p176_p7 = scmp.ne.s32.totalorder %s249_s2, %s175_s10  ;;  %p179_p8 = scmp.lt.u32.totalorder %s175_s10, %s249_s2 }
  0x54   :  { %p181_p9 = pnand %p179_p8, %p176_p7 }
  0x56   :  { %184 = shalt.err (!%p181_p9)
}
  0x57   :  { %99 = dma.vmem_to_hbm [thread:$0]  %s97_s6, 128, %s249_s2, [#allocation4]  }
  0x58   :  { %189 = dma.done.wait [#allocation4], 128  }
  0x59   :  { %190 = vsyncadd [#allocation4], 4294967168 }
  0x5a   :  { %103 = vsyncpa [#allocation3], 1 }
  0x5b   :  { %104 = vsyncpa [#allocation6], 1 }
  0x5c   :  { %105 = vsyncpa [#allocation4], 1 }

</bundles_post_ra>
